<compile_context>
chip_gen: v5e
topology: v5e:2x2
jax: 0.10.0
libtpu: 0.0.40
codegen_flags: <defaults>
</compile_context>

<pallas_src>
import functools
import math

import jax
import jax.numpy as jnp
from jax.experimental import pallas as pl
from jax.experimental.pallas import tpu as pltpu


def _round_up(x, m):
    return ((x + m - 1) // m) * m


# ----------------------------- Pallas GEMM kernel -----------------------------

def _gemm_bias_kernel(x_ref, w_ref, b_ref, o_ref, acc_ref):
    # x_ref: (tm, tk) bf16   w_ref: (tk, tn) bf16
    # b_ref: (1, tn)  f32    o_ref / acc_ref: (tm, tn) f32
    k = pl.program_id(2)

    @pl.when(k == 0)
    def _():
        acc_ref[...] = jnp.zeros_like(acc_ref)

    acc_ref[...] += jnp.dot(x_ref[...], w_ref[...],
                            preferred_element_type=jnp.float32)

    @pl.when(k == pl.num_programs(2) - 1)
    def _():
        o_ref[...] = acc_ref[...] + b_ref[...]


def _gemm_bias(patches, w_mat, bias):
    """patches: (M, K) f32, w_mat: (K, OC) f32, bias: (OC,) -> (M, OC) f32.

    Pads M/K/OC to tile multiples (lane-dense output), casts MXU operands to
    bf16, accumulates in f32 VMEM scratch, adds bias in f32, slices the pad off.
    """
    M, K = patches.shape
    OC = w_mat.shape[1]

    # Tile selection: sublane dims multiples of 8, lane dims multiples of 128.
    tm = min(512, _round_up(M, 8))
    tk = min(512, _round_up(K, 128))
    tn = min(256, _round_up(OC, 128))

    Mp = _round_up(M, tm)
    Kp = _round_up(K, tk)
    OCp = _round_up(OC, tn)

    x = jnp.pad(patches.astype(jnp.bfloat16), ((0, Mp - M), (0, Kp - K)))
    w = jnp.pad(w_mat.astype(jnp.bfloat16), ((0, Kp - K), (0, OCp - OC)))
    b = jnp.pad(bias.astype(jnp.float32), (0, OCp - OC)).reshape(1, OCp)

    grid = (Mp // tm, OCp // tn, Kp // tk)

    cost = pl.CostEstimate(
        flops=2 * Mp * Kp * OCp,
        transcendentals=0,
        bytes_accessed=Mp * Kp * 2 + Kp * OCp * 2 + Mp * OCp * 4 + OCp * 4,
    )

    out = pl.pallas_call(
        _gemm_bias_kernel,
        out_shape=jax.ShapeDtypeStruct((Mp, OCp), jnp.float32),
        grid_spec=pltpu.PrefetchScalarGridSpec(
            num_scalar_prefetch=0,
            grid=grid,
            in_specs=[
                pl.BlockSpec((tm, tk), lambda i, j, k: (i, k)),
                pl.BlockSpec((tk, tn), lambda i, j, k: (k, j)),
                pl.BlockSpec((1, tn), lambda i, j, k: (0, j)),
            ],
            out_specs=pl.BlockSpec((tm, tn), lambda i, j, k: (i, j)),
            scratch_shapes=[pltpu.VMEM((tm, tn), jnp.float32)],
        ),
        compiler_params=pltpu.CompilerParams(
            dimension_semantics=("parallel", "parallel", "arbitrary")),
        cost_estimate=cost,
    )(x, w, b)
    return out[:M, :OC]


# ------------------------------ conv glue (NHWC) -------------------------------

def _im2col_nhwc(x, kh, kw, stride, pad):
    """x: (N, H, W, C) -> patches (N*OH*OW, KH*KW*C); columns ordered (kh, kw, C)."""
    N, H, W, C = x.shape
    xp = jnp.pad(x, ((0, 0), (pad, pad), (pad, pad), (0, 0)))
    Hp, Wp = H + 2 * pad, W + 2 * pad
    oh = (Hp - kh) // stride + 1
    ow = (Wp - kw) // stride + 1
    cols = []
    for i in range(kh):
        for j in range(kw):
            cols.append(xp[:, i:i + stride * oh:stride, j:j + stride * ow:stride, :])
    col = jnp.stack(cols, axis=3)                     # (N, oh, ow, kh*kw, C)
    col = col.reshape(N * oh * ow, kh * kw * C)
    return col, oh, ow


def conv2d_nhwc_pallas(x, w_mat, bias, k, stride, pad):
    """x: (N, H, W, C), w_mat: (k*k*C, OC), bias: (OC,) -> (N, OH, OW, OC)."""
    N, H, W, C = x.shape
    OC = w_mat.shape[1]
    if k == 1 and stride == 1 and pad == 0:
        patches, oh, ow = x.reshape(N * H * W, C), H, W   # no im2col for 1x1
    else:
        patches, oh, ow = _im2col_nhwc(x, k, k, stride, pad)
    y = _gemm_bias(patches, w_mat, bias)
    return y.reshape(N, oh, ow, OC)


# ------------------------------- Extras module ---------------------------------

def _layer_defs(in_ch):
    # (name, in_ch, out_ch, kernel, stride, pad) -- static Python ints.
    return (
        ("conv1_1", in_ch,      in_ch // 4, 1, 1, 0),
        ("conv1_2", in_ch // 4, in_ch // 2, 3, 3, 7),
        ("conv2_1", in_ch // 2, in_ch // 8, 1, 1, 0),
        ("conv2_2", in_ch // 8, in_ch // 4, 3, 2, 1),
        ("conv3_1", in_ch // 4, in_ch // 8, 1, 1, 0),
        ("conv3_2", in_ch // 8, in_ch // 4, 3, 1, 0),
        ("conv4_1", in_ch // 4, in_ch // 8, 1, 1, 0),
        ("conv4_2", in_ch // 8, in_ch // 4, 3, 1, 0),
    )


def init_extras_params(in_ch, key):
    """PyTorch-default-like uniform init: OIHW weights + biases (arrays only)."""
    params = {}
    for name, ic, oc, k, _, _ in _layer_defs(in_ch):
        key, kw_, kb_ = jax.random.split(key, 3)
        fan_in = ic * k * k
        bound = 1.0 / math.sqrt(fan_in)
        w = jax.random.uniform(kw_, (oc, ic, k, k), jnp.float32, -bound, bound)
        b = jax.random.uniform(kb_, (oc,), jnp.float32, -bound, bound)
        params[name] = {"w": w, "b": b}
    return params


def flatten_weights(params, in_ch):
    """Pre-flatten OIHW weights to (KH*KW*C, OC) once, outside the jitted forward."""
    flat = {}
    for name, ic, oc, k, _, _ in _layer_defs(in_ch):
        w = params[name]["w"]                            # (OC, C, KH, KW)
        wm = w.transpose(2, 3, 1, 0).reshape(k * k * ic, oc)   # (kh,kw,C) ordering
        flat[name] = {"wm": wm, "b": params[name]["b"]}
    return flat


def extras_forward_pallas(flat_params, x_nchw, *, in_ch):
    """Matches PyTorch Extras.forward: returns (source3, source4, source5, source6)."""
    defs = _layer_defs(in_ch)
    t = x_nchw.transpose(0, 2, 3, 1)                     # NHWC across the chain
    sources = []
    for idx, (name, _, _, k, s, p) in enumerate(defs):
        t = conv2d_nhwc_pallas(t, flat_params[name]["wm"], flat_params[name]["b"],
                               k, s, p)
        if idx % 2 == 1:                                 # after each conv*_2
            sources.append(t.transpose(0, 3, 1, 2))      # NCHW at the boundary
    return tuple(sources)


# ------------------------------ reference (lax) ---------------------------------

def conv2d_ref(x, w, b, stride, pad):
    y = jax.lax.conv_general_dilated(
        x, w, window_strides=(stride, stride),
        padding=((pad, pad), (pad, pad)),
        dimension_numbers=("NCHW", "OIHW", "NCHW"))
    return y + b[None, :, None, None]


def extras_forward_ref(params, x, in_ch):
    sources = []
    t = x
    for idx, (name, _, _, _, s, p) in enumerate(_layer_defs(in_ch)):
        t = conv2d_ref(t, params[name]["w"], params[name]["b"], s, p)
        if idx % 2 == 1:
            sources.append(t)
    return tuple(sources)


# ----------------------------------- main ---------------------------------------

if __name__ == "__main__":
    key = jax.random.PRNGKey(0)
    k_x, k_p = jax.random.split(key)

    in_ch = 32
    x = jax.random.normal(k_x, (2, in_ch, 16, 16), jnp.float32)   # NCHW

    params = init_extras_params(in_ch, k_p)
    flat_params = flatten_weights(params, in_ch)

    fwd = jax.jit(functools.partial(extras_forward_pallas, in_ch=in_ch))
    outs = jax.block_until_ready(fwd(flat_params, x))

    refs = extras_forward_ref(params, x, in_ch)

    expected = [(2, in_ch // 2, 10, 10), (2, in_ch // 4, 5, 5),
                (2, in_ch // 4, 3, 3), (2, in_ch // 4, 1, 1)]
    for o, r, es in zip(outs, refs, expected):
        assert o.shape == r.shape == es, (o.shape, r.shape, es)
        # bf16 MXU operands with f32 accumulation -> loosened tolerance vs the
        # pure-f32 XLA reference.
        max_err = float(jnp.max(jnp.abs(o - r)))
        assert jnp.allclose(o, r, rtol=2e-2, atol=2e-2), max_err

    print("KERNEL_OK")
</pallas_src>

<mosaic_0001>
module attributes {stable_mosaic.version = 11 : i64} {
  func.func @_gemm_bias_kernel(%arg0: i32, %arg1: i32, %arg2: i32, %arg3: memref<512x128xbf16, #tpu.memory_space<vmem>>, %arg4: memref<128x128xbf16, #tpu.memory_space<vmem>>, %arg5: memref<1x128xf32, #tpu.memory_space<vmem>>, %arg6: memref<512x128xf32, #tpu.memory_space<vmem>>, %arg7: memref<512x128xf32, #tpu.memory_space<vmem>>) attributes {dimension_semantics = [#tpu.dimension_semantics<parallel>, #tpu.dimension_semantics<parallel>, #tpu.dimension_semantics<arbitrary>], iteration_bounds = array<i64: 1, 1, 1>, scalar_prefetch = 0 : i64, scratch_operands = 1 : i64, tpu.core_type = #tpu.core_type<tc>, window_params = [{transform_indices = @transform_0, window_bounds = array<i64: 512, 128>}, {transform_indices = @transform_1, window_bounds = array<i64: 128, 128>}, {transform_indices = @transform_2, window_bounds = array<i64: 1, 128>}, {transform_indices = @transform_3, window_bounds = array<i64: 512, 128>}]} {
    %c0_i32 = arith.constant 0 : i32
    %0 = arith.cmpi eq, %arg2, %c0_i32 : i32
    %1 = arith.extui %0 : i1 to i32
    %c0_i32_0 = arith.constant 0 : i32
    %2 = arith.cmpi ne, %1, %c0_i32_0 : i32
    scf.if %2 {
      %cst_10 = arith.constant 0.000000e+00 : f32
      %12 = vector.broadcast %cst_10 : f32 to vector<512x128xf32>
      %c0_11 = arith.constant 0 : index
      %c0_12 = arith.constant 0 : index
      %13 = vector.load %arg7[%c0_11, %c0_12] : memref<512x128xf32, #tpu.memory_space<vmem>>, vector<512x128xf32>
      tpu.vector_store %arg7[%c0_11, %c0_12], %12 {strides = array<i32>} : memref<512x128xf32, #tpu.memory_space<vmem>>, vector<512x128xf32>,
    } else {
    }
    %c0 = arith.constant 0 : index
    %c0_1 = arith.constant 0 : index
    %3 = vector.load %arg7[%c0, %c0_1] : memref<512x128xf32, #tpu.memory_space<vmem>>, vector<512x128xf32>
    %c0_2 = arith.constant 0 : index
    %c0_3 = arith.constant 0 : index
    %4 = vector.load %arg3[%c0_2, %c0_3] : memref<512x128xbf16, #tpu.memory_space<vmem>>, vector<512x128xbf16>
    %c0_4 = arith.constant 0 : index
    %c0_5 = arith.constant 0 : index
    %5 = vector.load %arg4[%c0_4, %c0_5] : memref<128x128xbf16, #tpu.memory_space<vmem>>, vector<128x128xbf16>
    %cst = arith.constant dense<0.000000e+00> : vector<512x128xf32>
    %6 = tpu.matmul %4, %5, %cst {dimension_numbers = #tpu.dot_dimension_numbers<[1], [0], [0], [1], [0, 0, 1, 1], [], []>} : vector<512x128xbf16>, vector<128x128xbf16>, vector<512x128xf32> -> vector<512x128xf32>
    %7 = arith.addf %3, %6 : vector<512x128xf32>
    %c0_6 = arith.constant 0 : index
    %c0_7 = arith.constant 0 : index
    %8 = vector.load %arg7[%c0_6, %c0_7] : memref<512x128xf32, #tpu.memory_space<vmem>>, vector<512x128xf32>
    tpu.vector_store %arg7[%c0_6, %c0_7], %7 {strides = array<i32>} : memref<512x128xf32, #tpu.memory_space<vmem>>, vector<512x128xf32>,
    %c0_i32_8 = arith.constant 0 : i32
    %9 = arith.cmpi eq, %arg2, %c0_i32_8 : i32
    %10 = arith.extui %9 : i1 to i32
    %c0_i32_9 = arith.constant 0 : i32
    %11 = arith.cmpi ne, %10, %c0_i32_9 : i32
    scf.if %11 {
      %c0_10 = arith.constant 0 : index
      %c0_11 = arith.constant 0 : index
      %12 = vector.load %arg7[%c0_10, %c0_11] : memref<512x128xf32, #tpu.memory_space<vmem>>, vector<512x128xf32>
      %c0_12 = arith.constant 0 : index
      %c0_13 = arith.constant 0 : index
      %13 = vector.load %arg5[%c0_12, %c0_13] : memref<1x128xf32, #tpu.memory_space<vmem>>, vector<1x128xf32>
      %14 = vector.broadcast %13 : vector<1x128xf32> to vector<512x128xf32>
      %15 = arith.addf %12, %14 : vector<512x128xf32>
      %c0_14 = arith.constant 0 : index
      %c0_15 = arith.constant 0 : index
      %16 = vector.load %arg6[%c0_14, %c0_15] : memref<512x128xf32, #tpu.memory_space<vmem>>, vector<512x128xf32>
      tpu.vector_store %arg6[%c0_14, %c0_15], %15 {strides = array<i32>} : memref<512x128xf32, #tpu.memory_space<vmem>>, vector<512x128xf32>,
    } else {
    }
    return
  }
  func.func @transform_0(%arg0: i32, %arg1: i32, %arg2: i32) -> (i32, i32) {
    %c0_i32 = arith.constant 0 : i32
    return %arg0, %arg2 : i32, i32
  }
  func.func @transform_1(%arg0: i32, %arg1: i32, %arg2: i32) -> (i32, i32) {
    %c0_i32 = arith.constant 0 : i32
    return %arg2, %arg1 : i32, i32
  }
  func.func @transform_2(%arg0: i32, %arg1: i32, %arg2: i32) -> (i32, i32) {
    %c0_i32 = arith.constant 0 : i32
    %c0_i32_0 = arith.constant 0 : i32
    return %c0_i32, %arg1 : i32, i32
  }
  func.func @transform_3(%arg0: i32, %arg1: i32, %arg2: i32) -> (i32, i32) {
    %c0_i32 = arith.constant 0 : i32
    return %arg0, %arg1 : i32, i32
  }
}

module attributes {stable_mosaic.version = 11 : i64} {
  func.func @_gemm_bias_kernel(%arg0: i32, %arg1: i32, %arg2: i32, %arg3: memref<200x128xbf16, #tpu.memory_space<vmem>>, %arg4: memref<128x128xbf16, #tpu.memory_space<vmem>>, %arg5: memref<1x128xf32, #tpu.memory_space<vmem>>, %arg6: memref<200x128xf32, #tpu.memory_space<vmem>>, %arg7: memref<200x128xf32, #tpu.memory_space<vmem>>) attributes {dimension_semantics = [#tpu.dimension_semantics<parallel>, #tpu.dimension_semantics<parallel>, #tpu.dimension_semantics<arbitrary>], iteration_bounds = array<i64: 1, 1, 1>, scalar_prefetch = 0 : i64, scratch_operands = 1 : i64, tpu.core_type = #tpu.core_type<tc>, window_params = [{transform_indices = @transform_0, window_bounds = array<i64: 200, 128>}, {transform_indices = @transform_1, window_bounds = array<i64: 128, 128>}, {transform_indices = @transform_2, window_bounds = array<i64: 1, 128>}, {transform_indices = @transform_3, window_bounds = array<i64: 200, 128>}]} {
    %c0_i32 = arith.constant 0 : i32
    %0 = arith.cmpi eq, %arg2, %c0_i32 : i32
    %1 = arith.extui %0 : i1 to i32
    %c0_i32_0 = arith.constant 0 : i32
    %2 = arith.cmpi ne, %1, %c0_i32_0 : i32
    scf.if %2 {
      %cst_10 = arith.constant 0.000000e+00 : f32
      %12 = vector.broadcast %cst_10 : f32 to vector<200x128xf32>
      %c0_11 = arith.constant 0 : index
      %c0_12 = arith.constant 0 : index
      %13 = vector.load %arg7[%c0_11, %c0_12] : memref<200x128xf32, #tpu.memory_space<vmem>>, vector<200x128xf32>
      tpu.vector_store %arg7[%c0_11, %c0_12], %12 {strides = array<i32>} : memref<200x128xf32, #tpu.memory_space<vmem>>, vector<200x128xf32>,
    } else {
    }
    %c0 = arith.constant 0 : index
    %c0_1 = arith.constant 0 : index
    %3 = vector.load %arg7[%c0, %c0_1] : memref<200x128xf32, #tpu.memory_space<vmem>>, vector<200x128xf32>
    %c0_2 = arith.constant 0 : index
    %c0_3 = arith.constant 0 : index
    %4 = vector.load %arg3[%c0_2, %c0_3] : memref<200x128xbf16, #tpu.memory_space<vmem>>, vector<200x128xbf16>
    %c0_4 = arith.constant 0 : index
    %c0_5 = arith.constant 0 : index
    %5 = vector.load %arg4[%c0_4, %c0_5] : memref<128x128xbf16, #tpu.memory_space<vmem>>, vector<128x128xbf16>
    %cst = arith.constant dense<0.000000e+00> : vector<200x128xf32>
    %6 = tpu.matmul %4, %5, %cst {dimension_numbers = #tpu.dot_dimension_numbers<[1], [0], [0], [1], [0, 0, 1, 1], [], []>} : vector<200x128xbf16>, vector<128x128xbf16>, vector<200x128xf32> -> vector<200x128xf32>
    %7 = arith.addf %3, %6 : vector<200x128xf32>
    %c0_6 = arith.constant 0 : index
    %c0_7 = arith.constant 0 : index
    %8 = vector.load %arg7[%c0_6, %c0_7] : memref<200x128xf32, #tpu.memory_space<vmem>>, vector<200x128xf32>
    tpu.vector_store %arg7[%c0_6, %c0_7], %7 {strides = array<i32>} : memref<200x128xf32, #tpu.memory_space<vmem>>, vector<200x128xf32>,
    %c0_i32_8 = arith.constant 0 : i32
    %9 = arith.cmpi eq, %arg2, %c0_i32_8 : i32
    %10 = arith.extui %9 : i1 to i32
    %c0_i32_9 = arith.constant 0 : i32
    %11 = arith.cmpi ne, %10, %c0_i32_9 : i32
    scf.if %11 {
      %c0_10 = arith.constant 0 : index
      %c0_11 = arith.constant 0 : index
      %12 = vector.load %arg7[%c0_10, %c0_11] : memref<200x128xf32, #tpu.memory_space<vmem>>, vector<200x128xf32>
      %c0_12 = arith.constant 0 : index
      %c0_13 = arith.constant 0 : index
      %13 = vector.load %arg5[%c0_12, %c0_13] : memref<1x128xf32, #tpu.memory_space<vmem>>, vector<1x128xf32>
      %14 = vector.broadcast %13 : vector<1x128xf32> to vector<200x128xf32>
      %15 = arith.addf %12, %14 : vector<200x128xf32>
      %c0_14 = arith.constant 0 : index
      %c0_15 = arith.constant 0 : index
      %16 = vector.load %arg6[%c0_14, %c0_15] : memref<200x128xf32, #tpu.memory_space<vmem>>, vector<200x128xf32>
      tpu.vector_store %arg6[%c0_14, %c0_15], %15 {strides = array<i32>} : memref<200x128xf32, #tpu.memory_space<vmem>>, vector<200x128xf32>,
    } else {
    }
    return
  }
  func.func @transform_0(%arg0: i32, %arg1: i32, %arg2: i32) -> (i32, i32) {
    %c0_i32 = arith.constant 0 : i32
    return %arg0, %arg2 : i32, i32
  }
  func.func @transform_1(%arg0: i32, %arg1: i32, %arg2: i32) -> (i32, i32) {
    %c0_i32 = arith.constant 0 : i32
    return %arg2, %arg1 : i32, i32
  }
  func.func @transform_2(%arg0: i32, %arg1: i32, %arg2: i32) -> (i32, i32) {
    %c0_i32 = arith.constant 0 : i32
    %c0_i32_0 = arith.constant 0 : i32
    return %c0_i32, %arg1 : i32, i32
  }
  func.func @transform_3(%arg0: i32, %arg1: i32, %arg2: i32) -> (i32, i32) {
    %c0_i32 = arith.constant 0 : i32
    return %arg0, %arg1 : i32, i32
  }
}

module attributes {stable_mosaic.version = 11 : i64} {
  func.func @_gemm_bias_kernel(%arg0: i32, %arg1: i32, %arg2: i32, %arg3: memref<56x128xbf16, #tpu.memory_space<vmem>>, %arg4: memref<128x128xbf16, #tpu.memory_space<vmem>>, %arg5: memref<1x128xf32, #tpu.memory_space<vmem>>, %arg6: memref<56x128xf32, #tpu.memory_space<vmem>>, %arg7: memref<56x128xf32, #tpu.memory_space<vmem>>) attributes {dimension_semantics = [#tpu.dimension_semantics<parallel>, #tpu.dimension_semantics<parallel>, #tpu.dimension_semantics<arbitrary>], iteration_bounds = array<i64: 1, 1, 1>, scalar_prefetch = 0 : i64, scratch_operands = 1 : i64, tpu.core_type = #tpu.core_type<tc>, window_params = [{transform_indices = @transform_0, window_bounds = array<i64: 56, 128>}, {transform_indices = @transform_1, window_bounds = array<i64: 128, 128>}, {transform_indices = @transform_2, window_bounds = array<i64: 1, 128>}, {transform_indices = @transform_3, window_bounds = array<i64: 56, 128>}]} {
    %c0_i32 = arith.constant 0 : i32
    %0 = arith.cmpi eq, %arg2, %c0_i32 : i32
    %1 = arith.extui %0 : i1 to i32
    %c0_i32_0 = arith.constant 0 : i32
    %2 = arith.cmpi ne, %1, %c0_i32_0 : i32
    scf.if %2 {
      %cst_10 = arith.constant 0.000000e+00 : f32
      %12 = vector.broadcast %cst_10 : f32 to vector<56x128xf32>
      %c0_11 = arith.constant 0 : index
      %c0_12 = arith.constant 0 : index
      %13 = vector.load %arg7[%c0_11, %c0_12] : memref<56x128xf32, #tpu.memory_space<vmem>>, vector<56x128xf32>
      tpu.vector_store %arg7[%c0_11, %c0_12], %12 {strides = array<i32>} : memref<56x128xf32, #tpu.memory_space<vmem>>, vector<56x128xf32>,
    } else {
    }
    %c0 = arith.constant 0 : index
    %c0_1 = arith.constant 0 : index
    %3 = vector.load %arg7[%c0, %c0_1] : memref<56x128xf32, #tpu.memory_space<vmem>>, vector<56x128xf32>
    %c0_2 = arith.constant 0 : index
    %c0_3 = arith.constant 0 : index
    %4 = vector.load %arg3[%c0_2, %c0_3] : memref<56x128xbf16, #tpu.memory_space<vmem>>, vector<56x128xbf16>
    %c0_4 = arith.constant 0 : index
    %c0_5 = arith.constant 0 : index
    %5 = vector.load %arg4[%c0_4, %c0_5] : memref<128x128xbf16, #tpu.memory_space<vmem>>, vector<128x128xbf16>
    %cst = arith.constant dense<0.000000e+00> : vector<56x128xf32>
    %6 = tpu.matmul %4, %5, %cst {dimension_numbers = #tpu.dot_dimension_numbers<[1], [0], [0], [1], [0, 0, 1, 1], [], []>} : vector<56x128xbf16>, vector<128x128xbf16>, vector<56x128xf32> -> vector<56x128xf32>
    %7 = arith.addf %3, %6 : vector<56x128xf32>
    %c0_6 = arith.constant 0 : index
    %c0_7 = arith.constant 0 : index
    %8 = vector.load %arg7[%c0_6, %c0_7] : memref<56x128xf32, #tpu.memory_space<vmem>>, vector<56x128xf32>
    tpu.vector_store %arg7[%c0_6, %c0_7], %7 {strides = array<i32>} : memref<56x128xf32, #tpu.memory_space<vmem>>, vector<56x128xf32>,
    %c0_i32_8 = arith.constant 0 : i32
    %9 = arith.cmpi eq, %arg2, %c0_i32_8 : i32
    %10 = arith.extui %9 : i1 to i32
    %c0_i32_9 = arith.constant 0 : i32
    %11 = arith.cmpi ne, %10, %c0_i32_9 : i32
    scf.if %11 {
      %c0_10 = arith.constant 0 : index
      %c0_11 = arith.constant 0 : index
      %12 = vector.load %arg7[%c0_10, %c0_11] : memref<56x128xf32, #tpu.memory_space<vmem>>, vector<56x128xf32>
      %c0_12 = arith.constant 0 : index
      %c0_13 = arith.constant 0 : index
      %13 = vector.load %arg5[%c0_12, %c0_13] : memref<1x128xf32, #tpu.memory_space<vmem>>, vector<1x128xf32>
      %14 = vector.broadcast %13 : vector<1x128xf32> to vector<56x128xf32>
      %15 = arith.addf %12, %14 : vector<56x128xf32>
      %c0_14 = arith.constant 0 : index
      %c0_15 = arith.constant 0 : index
      %16 = vector.load %arg6[%c0_14, %c0_15] : memref<56x128xf32, #tpu.memory_space<vmem>>, vector<56x128xf32>
      tpu.vector_store %arg6[%c0_14, %c0_15], %15 {strides = array<i32>} : memref<56x128xf32, #tpu.memory_space<vmem>>, vector<56x128xf32>,
    } else {
    }
    return
  }
  func.func @transform_0(%arg0: i32, %arg1: i32, %arg2: i32) -> (i32, i32) {
    %c0_i32 = arith.constant 0 : i32
    return %arg0, %arg2 : i32, i32
  }
  func.func @transform_1(%arg0: i32, %arg1: i32, %arg2: i32) -> (i32, i32) {
    %c0_i32 = arith.constant 0 : i32
    return %arg2, %arg1 : i32, i32
  }
  func.func @transform_2(%arg0: i32, %arg1: i32, %arg2: i32) -> (i32, i32) {
    %c0_i32 = arith.constant 0 : i32
    %c0_i32_0 = arith.constant 0 : i32
    return %c0_i32, %arg1 : i32, i32
  }
  func.func @transform_3(%arg0: i32, %arg1: i32, %arg2: i32) -> (i32, i32) {
    %c0_i32 = arith.constant 0 : i32
    return %arg0, %arg1 : i32, i32
  }
}

module attributes {stable_mosaic.version = 11 : i64} {
  func.func @_gemm_bias_kernel(%arg0: i32, %arg1: i32, %arg2: i32, %arg3: memref<24x128xbf16, #tpu.memory_space<vmem>>, %arg4: memref<128x128xbf16, #tpu.memory_space<vmem>>, %arg5: memref<1x128xf32, #tpu.memory_space<vmem>>, %arg6: memref<24x128xf32, #tpu.memory_space<vmem>>, %arg7: memref<24x128xf32, #tpu.memory_space<vmem>>) attributes {dimension_semantics = [#tpu.dimension_semantics<parallel>, #tpu.dimension_semantics<parallel>, #tpu.dimension_semantics<arbitrary>], iteration_bounds = array<i64: 1, 1, 1>, scalar_prefetch = 0 : i64, scratch_operands = 1 : i64, tpu.core_type = #tpu.core_type<tc>, window_params = [{transform_indices = @transform_0, window_bounds = array<i64: 24, 128>}, {transform_indices = @transform_1, window_bounds = array<i64: 128, 128>}, {transform_indices = @transform_2, window_bounds = array<i64: 1, 128>}, {transform_indices = @transform_3, window_bounds = array<i64: 24, 128>}]} {
    %c0_i32 = arith.constant 0 : i32
    %0 = arith.cmpi eq, %arg2, %c0_i32 : i32
    %1 = arith.extui %0 : i1 to i32
    %c0_i32_0 = arith.constant 0 : i32
    %2 = arith.cmpi ne, %1, %c0_i32_0 : i32
    scf.if %2 {
      %cst_10 = arith.constant 0.000000e+00 : f32
      %12 = vector.broadcast %cst_10 : f32 to vector<24x128xf32>
      %c0_11 = arith.constant 0 : index
      %c0_12 = arith.constant 0 : index
      %13 = vector.load %arg7[%c0_11, %c0_12] : memref<24x128xf32, #tpu.memory_space<vmem>>, vector<24x128xf32>
      tpu.vector_store %arg7[%c0_11, %c0_12], %12 {strides = array<i32>} : memref<24x128xf32, #tpu.memory_space<vmem>>, vector<24x128xf32>,
    } else {
    }
    %c0 = arith.constant 0 : index
    %c0_1 = arith.constant 0 : index
    %3 = vector.load %arg7[%c0, %c0_1] : memref<24x128xf32, #tpu.memory_space<vmem>>, vector<24x128xf32>
    %c0_2 = arith.constant 0 : index
    %c0_3 = arith.constant 0 : index
    %4 = vector.load %arg3[%c0_2, %c0_3] : memref<24x128xbf16, #tpu.memory_space<vmem>>, vector<24x128xbf16>
    %c0_4 = arith.constant 0 : index
    %c0_5 = arith.constant 0 : index
    %5 = vector.load %arg4[%c0_4, %c0_5] : memref<128x128xbf16, #tpu.memory_space<vmem>>, vector<128x128xbf16>
    %cst = arith.constant dense<0.000000e+00> : vector<24x128xf32>
    %6 = tpu.matmul %4, %5, %cst {dimension_numbers = #tpu.dot_dimension_numbers<[1], [0], [0], [1], [0, 0, 1, 1], [], []>} : vector<24x128xbf16>, vector<128x128xbf16>, vector<24x128xf32> -> vector<24x128xf32>
    %7 = arith.addf %3, %6 : vector<24x128xf32>
    %c0_6 = arith.constant 0 : index
    %c0_7 = arith.constant 0 : index
    %8 = vector.load %arg7[%c0_6, %c0_7] : memref<24x128xf32, #tpu.memory_space<vmem>>, vector<24x128xf32>
    tpu.vector_store %arg7[%c0_6, %c0_7], %7 {strides = array<i32>} : memref<24x128xf32, #tpu.memory_space<vmem>>, vector<24x128xf32>,
    %c0_i32_8 = arith.constant 0 : i32
    %9 = arith.cmpi eq, %arg2, %c0_i32_8 : i32
    %10 = arith.extui %9 : i1 to i32
    %c0_i32_9 = arith.constant 0 : i32
    %11 = arith.cmpi ne, %10, %c0_i32_9 : i32
    scf.if %11 {
      %c0_10 = arith.constant 0 : index
      %c0_11 = arith.constant 0 : index
      %12 = vector.load %arg7[%c0_10, %c0_11] : memref<24x128xf32, #tpu.memory_space<vmem>>, vector<24x128xf32>
      %c0_12 = arith.constant 0 : index
      %c0_13 = arith.constant 0 : index
      %13 = vector.load %arg5[%c0_12, %c0_13] : memref<1x128xf32, #tpu.memory_space<vmem>>, vector<1x128xf32>
      %14 = vector.broadcast %13 : vector<1x128xf32> to vector<24x128xf32>
      %15 = arith.addf %12, %14 : vector<24x128xf32>
      %c0_14 = arith.constant 0 : index
      %c0_15 = arith.constant 0 : index
      %16 = vector.load %arg6[%c0_14, %c0_15] : memref<24x128xf32, #tpu.memory_space<vmem>>, vector<24x128xf32>
      tpu.vector_store %arg6[%c0_14, %c0_15], %15 {strides = array<i32>} : memref<24x128xf32, #tpu.memory_space<vmem>>, vector<24x128xf32>,
    } else {
    }
    return
  }
  func.func @transform_0(%arg0: i32, %arg1: i32, %arg2: i32) -> (i32, i32) {
    %c0_i32 = arith.constant 0 : i32
    return %arg0, %arg2 : i32, i32
  }
  func.func @transform_1(%arg0: i32, %arg1: i32, %arg2: i32) -> (i32, i32) {
    %c0_i32 = arith.constant 0 : i32
    return %arg2, %arg1 : i32, i32
  }
  func.func @transform_2(%arg0: i32, %arg1: i32, %arg2: i32) -> (i32, i32) {
    %c0_i32 = arith.constant 0 : i32
    %c0_i32_0 = arith.constant 0 : i32
    return %c0_i32, %arg1 : i32, i32
  }
  func.func @transform_3(%arg0: i32, %arg1: i32, %arg2: i32) -> (i32, i32) {
    %c0_i32 = arith.constant 0 : i32
    return %arg0, %arg1 : i32, i32
  }
}

module attributes {stable_mosaic.version = 11 : i64} {
  func.func @_gemm_bias_kernel(%arg0: i32, %arg1: i32, %arg2: i32, %arg3: memref<8x128xbf16, #tpu.memory_space<vmem>>, %arg4: memref<128x128xbf16, #tpu.memory_space<vmem>>, %arg5: memref<1x128xf32, #tpu.memory_space<vmem>>, %arg6: memref<8x128xf32, #tpu.memory_space<vmem>>, %arg7: memref<8x128xf32, #tpu.memory_space<vmem>>) attributes {dimension_semantics = [#tpu.dimension_semantics<parallel>, #tpu.dimension_semantics<parallel>, #tpu.dimension_semantics<arbitrary>], iteration_bounds = array<i64: 1, 1, 1>, scalar_prefetch = 0 : i64, scratch_operands = 1 : i64, tpu.core_type = #tpu.core_type<tc>, window_params = [{transform_indices = @transform_0, window_bounds = array<i64: 8, 128>}, {transform_indices = @transform_1, window_bounds = array<i64: 128, 128>}, {transform_indices = @transform_2, window_bounds = array<i64: 1, 128>}, {transform_indices = @transform_3, window_bounds = array<i64: 8, 128>}]} {
    %c0_i32 = arith.constant 0 : i32
    %0 = arith.cmpi eq, %arg2, %c0_i32 : i32
    %1 = arith.extui %0 : i1 to i32
    %c0_i32_0 = arith.constant 0 : i32
    %2 = arith.cmpi ne, %1, %c0_i32_0 : i32
    scf.if %2 {
      %cst_10 = arith.constant 0.000000e+00 : f32
      %12 = vector.broadcast %cst_10 : f32 to vector<8x128xf32>
      %c0_11 = arith.constant 0 : index
      %c0_12 = arith.constant 0 : index
      %13 = vector.load %arg7[%c0_11, %c0_12] : memref<8x128xf32, #tpu.memory_space<vmem>>, vector<8x128xf32>
      tpu.vector_store %arg7[%c0_11, %c0_12], %12 {strides = array<i32>} : memref<8x128xf32, #tpu.memory_space<vmem>>, vector<8x128xf32>,
    } else {
    }
    %c0 = arith.constant 0 : index
    %c0_1 = arith.constant 0 : index
    %3 = vector.load %arg7[%c0, %c0_1] : memref<8x128xf32, #tpu.memory_space<vmem>>, vector<8x128xf32>
    %c0_2 = arith.constant 0 : index
    %c0_3 = arith.constant 0 : index
    %4 = vector.load %arg3[%c0_2, %c0_3] : memref<8x128xbf16, #tpu.memory_space<vmem>>, vector<8x128xbf16>
    %c0_4 = arith.constant 0 : index
    %c0_5 = arith.constant 0 : index
    %5 = vector.load %arg4[%c0_4, %c0_5] : memref<128x128xbf16, #tpu.memory_space<vmem>>, vector<128x128xbf16>
    %cst = arith.constant dense<0.000000e+00> : vector<8x128xf32>
    %6 = tpu.matmul %4, %5, %cst {dimension_numbers = #tpu.dot_dimension_numbers<[1], [0], [0], [1], [0, 0, 1, 1], [], []>} : vector<8x128xbf16>, vector<128x128xbf16>, vector<8x128xf32> -> vector<8x128xf32>
    %7 = arith.addf %3, %6 : vector<8x128xf32>
    %c0_6 = arith.constant 0 : index
    %c0_7 = arith.constant 0 : index
    %8 = vector.load %arg7[%c0_6, %c0_7] : memref<8x128xf32, #tpu.memory_space<vmem>>, vector<8x128xf32>
    tpu.vector_store %arg7[%c0_6, %c0_7], %7 {strides = array<i32>} : memref<8x128xf32, #tpu.memory_space<vmem>>, vector<8x128xf32>,
    %c0_i32_8 = arith.constant 0 : i32
    %9 = arith.cmpi eq, %arg2, %c0_i32_8 : i32
    %10 = arith.extui %9 : i1 to i32
    %c0_i32_9 = arith.constant 0 : i32
    %11 = arith.cmpi ne, %10, %c0_i32_9 : i32
    scf.if %11 {
      %c0_10 = arith.constant 0 : index
      %c0_11 = arith.constant 0 : index
      %12 = vector.load %arg7[%c0_10, %c0_11] : memref<8x128xf32, #tpu.memory_space<vmem>>, vector<8x128xf32>
      %c0_12 = arith.constant 0 : index
      %c0_13 = arith.constant 0 : index
      %13 = vector.load %arg5[%c0_12, %c0_13] : memref<1x128xf32, #tpu.memory_space<vmem>>, vector<1x128xf32>
      %14 = vector.broadcast %13 : vector<1x128xf32> to vector<8x128xf32>
      %15 = arith.addf %12, %14 : vector<8x128xf32>
      %c0_14 = arith.constant 0 : index
      %c0_15 = arith.constant 0 : index
      %16 = vector.load %arg6[%c0_14, %c0_15] : memref<8x128xf32, #tpu.memory_space<vmem>>, vector<8x128xf32>
      tpu.vector_store %arg6[%c0_14, %c0_15], %15 {strides = array<i32>} : memref<8x128xf32, #tpu.memory_space<vmem>>, vector<8x128xf32>,
    } else {
    }
    return
  }
  func.func @transform_0(%arg0: i32, %arg1: i32, %arg2: i32) -> (i32, i32) {
    %c0_i32 = arith.constant 0 : i32
    return %arg0, %arg2 : i32, i32
  }
  func.func @transform_1(%arg0: i32, %arg1: i32, %arg2: i32) -> (i32, i32) {
    %c0_i32 = arith.constant 0 : i32
    return %arg2, %arg1 : i32, i32
  }
  func.func @transform_2(%arg0: i32, %arg1: i32, %arg2: i32) -> (i32, i32) {
    %c0_i32 = arith.constant 0 : i32
    %c0_i32_0 = arith.constant 0 : i32
    return %c0_i32, %arg1 : i32, i32
  }
  func.func @transform_3(%arg0: i32, %arg1: i32, %arg2: i32) -> (i32, i32) {
    %c0_i32 = arith.constant 0 : i32
    return %arg0, %arg1 : i32, i32
  }
}

</mosaic_0001>

<bundles_post_ra>
// kernel: extras_forward_pallas.8
= control target key start
LH: loop header
LB: loop body
LE: loop exit
PB: predicated region body
PF: predicated region fallthrough
CT: control target
= control target key end

     0   :  { %s1592_s1 = inlined_call_operand.vmem [shape: bf16[128,128], index: 1, kind: input, shape index: {}]   ;;  %s1593_s2 = inlined_call_operand.vmem [shape: f32[1,128], index: 2, kind: input, shape index: {}]   ;;  %s1594_s0 = inlined_call_operand.vmem [shape: bf16[512,128], index: 0, kind: input, shape index: {}]   ;;  %s1595_s3 = inlined_call_operand.vmem [shape: f32[512,128], index: 3, kind: output, shape index: {}]  }
   0x1   :  { %v1165_v0 = vld [vmem:[%s1592_s1 + $0x38] sm:$0xff]  ;;  %v1164_v1 = vld [vmem:[%s1592_s1 + $0x30] sm:$0xff]  ;;  %v1163_v2 = vld [vmem:[%s1592_s1 + $0x28] sm:$0xff] }
   0x2   :  { %466 = vmatpush.bf16.msra.mxu0 %v1165_v0  ;;  %1166 = vmatpush.bf16.msra.mxu1 %v1165_v0  ;;  %v1162_v3 = vld [vmem:[%s1592_s1 + $0x20] sm:$0xff]  ;;  %v1161_v4 = vld [vmem:[%s1592_s1 + $0x18] sm:$0xff]  ;;  %v1160_v5 = vld [vmem:[%s1592_s1 + $0x10] sm:$0xff] }
   0x3   :  { %1167 = vmatpush.bf16.msra.mxu2 %v1165_v0  ;;  %1168 = vmatpush.bf16.msra.mxu3 %v1165_v0  ;;  %v1159_v6 = vld [vmem:[%s1592_s1 + $0x8] sm:$0xff]  ;;  %v1158_v7 = vld [vmem:[%s1592_s1] sm:$0xff]  ;;  %v1128_v16 = vld [vmem:[%s1594_s0 + $0x10] sm:$0xff] }
   0x4   :  { %v1126_v8 = vld [vmem:[%s1594_s0] sm:$0xff]  ;;  %v1127_v12 = vld [vmem:[%s1594_s0 + $0x8] sm:$0xff]  ;;  %v1136_v17 = vld [vmem:[%s1594_s0 + $0x50] sm:$0xff] }
   0x5   :  { %v1134_v9 = vld [vmem:[%s1594_s0 + $0x40] sm:$0xff]  ;;  %v1135_v13 = vld [vmem:[%s1594_s0 + $0x48] sm:$0xff]  ;;  %v1144_v18 = vld [vmem:[%s1594_s0 + $0x90] sm:$0xff] }
   0x6   :  { %467 = vmatpush.bf16.msra.mxu0 %v1164_v1  ;;  %1169 = vmatpush.bf16.msra.mxu1 %v1164_v1  ;;  %v1142_v10 = vld [vmem:[%s1594_s0 + $0x80] sm:$0xff]  ;;  %v1143_v14 = vld [vmem:[%s1594_s0 + $0x88] sm:$0xff]  ;;  %v1152_v19 = vld [vmem:[%s1594_s0 + $0xd0] sm:$0xff] }
   0x7   :  { %1170 = vmatpush.bf16.msra.mxu2 %v1164_v1  ;;  %1171 = vmatpush.bf16.msra.mxu3 %v1164_v1  ;;  %v1150_v11 = vld [vmem:[%s1594_s0 + $0xc0] sm:$0xff]  ;;  %v1151_v15 = vld [vmem:[%s1594_s0 + $0xc8] sm:$0xff]  ;;  %v1129_v20 = vld [vmem:[%s1594_s0 + $0x18] sm:$0xff] }
   0x8   :  { %v1137_v21 = vld [vmem:[%s1594_s0 + $0x58] sm:$0xff]  ;;  %v1130_v24 = vld [vmem:[%s1594_s0 + $0x20] sm:$0xff]  ;;  %v1131_v28 = vld [vmem:[%s1594_s0 + $0x28] sm:$0xff] }
   0x9   :  { %v1145_v22 = vld [vmem:[%s1594_s0 + $0x98] sm:$0xff]  ;;  %v1138_v25 = vld [vmem:[%s1594_s0 + $0x60] sm:$0xff]  ;;  %v1139_v29 = vld [vmem:[%s1594_s0 + $0x68] sm:$0xff] }
   0xa   :  { %468 = vmatpush.bf16.msra.mxu0 %v1163_v2  ;;  %1172 = vmatpush.bf16.msra.mxu1 %v1163_v2  ;;  %v1153_v23 = vld [vmem:[%s1594_s0 + $0xd8] sm:$0xff]  ;;  %v1146_v26 = vld [vmem:[%s1594_s0 + $0xa0] sm:$0xff]  ;;  %v1147_v30 = vld [vmem:[%s1594_s0 + $0xa8] sm:$0xff] }
   0xb   :  { %1173 = vmatpush.bf16.msra.mxu2 %v1163_v2  ;;  %1174 = vmatpush.bf16.msra.mxu3 %v1163_v2  ;;  %v1154_v27 = vld [vmem:[%s1594_s0 + $0xe0] sm:$0xff]  ;;  %v1155_v31 = vld [vmem:[%s1594_s0 + $0xe8] sm:$0xff]  ;;  %v1132_v32 = vld [vmem:[%s1594_s0 + $0x30] sm:$0xff] }
   0xc   :  { %v1140_v33 = vld [vmem:[%s1594_s0 + $0x70] sm:$0xff]  ;;  %v1133_v36 = vld [vmem:[%s1594_s0 + $0x38] sm:$0xff]  ;;  %v1334_v40 = vld [vmem:[%s1593_s2] ss:$0 sm:$0xff] }
   0xd   :  { %v1148_v34 = vld [vmem:[%s1594_s0 + $0xb0] sm:$0xff]  ;;  %v1141_v37 = vld [vmem:[%s1594_s0 + $0x78] sm:$0xff] }
   0xe   :  { %469 = vmatpush.bf16.msra.mxu0 %v1162_v3  ;;  %1175 = vmatpush.bf16.msra.mxu1 %v1162_v3  ;;  %v1156_v35 = vld [vmem:[%s1594_s0 + $0xf0] sm:$0xff]  ;;  %v1149_v38 = vld [vmem:[%s1594_s0 + $0xb8] sm:$0xff] }
   0xf   :  { %1176 = vmatpush.bf16.msra.mxu2 %v1162_v3  ;;  %1177 = vmatpush.bf16.msra.mxu3 %v1162_v3  ;;  %v1157_v39 = vld [vmem:[%s1594_s0 + $0xf8] sm:$0xff] }
  0x12   :  { %470 = vmatpush.bf16.msra.mxu0 %v1161_v4  ;;  %1178 = vmatpush.bf16.msra.mxu1 %v1161_v4 }
  0x13   :  { %1179 = vmatpush.bf16.msra.mxu2 %v1161_v4  ;;  %1180 = vmatpush.bf16.msra.mxu3 %v1161_v4 }
  0x16   :  { %471 = vmatpush.bf16.msra.mxu0 %v1160_v5  ;;  %1181 = vmatpush.bf16.msra.mxu1 %v1160_v5 }
  0x17   :  { %1182 = vmatpush.bf16.msra.mxu2 %v1160_v5  ;;  %1183 = vmatpush.bf16.msra.mxu3 %v1160_v5 }
  0x1a   :  { %472 = vmatpush.bf16.msra.mxu0 %v1159_v6  ;;  %1184 = vmatpush.bf16.msra.mxu1 %v1159_v6 }
  0x1b   :  { %1185 = vmatpush.bf16.msra.mxu2 %v1159_v6  ;;  %1186 = vmatpush.bf16.msra.mxu3 %v1159_v6 }
  0x1e   :  { %473 = vmatpush.bf16.msra.mxu0 %v1158_v7  ;;  %1187 = vmatpush.bf16.msra.mxu1 %v1158_v7 }
  0x1f   :  { %1188 = vmatpush.bf16.msra.mxu2 %v1158_v7  ;;  %1189 = vmatpush.bf16.msra.mxu3 %v1158_v7 }
  0x21   :  { %474 = vmatmul.bf16.vlgmr.msra.gmra.mxu0 %v1126_v8  ;;  %514 = vmatmul.bf16.vlgmr.msra.gmra.mxu1 %v1134_v9 }
  0x22   :  { %554 = vmatmul.bf16.vlgmr.msra.gmra.mxu2 %v1142_v10  ;;  %594 = vmatmul.bf16.vlgmr.msra.gmra.mxu3 %v1150_v11 }
  0x31   :  { %479 = vmatmul.bf16.gmra.mxu0 %v1127_v12  ;;  %519 = vmatmul.bf16.gmra.mxu1 %v1135_v13 }
  0x32   :  { %559 = vmatmul.bf16.gmra.mxu2 %v1143_v14  ;;  %599 = vmatmul.bf16.gmra.mxu3 %v1151_v15 }
  0x41   :  { %484 = vmatmul.bf16.gmra.mxu0 %v1128_v16  ;;  %524 = vmatmul.bf16.gmra.mxu1 %v1136_v17 }
  0x42   :  { %564 = vmatmul.bf16.gmra.mxu2 %v1144_v18  ;;  %604 = vmatmul.bf16.gmra.mxu3 %v1152_v19 }
  0x51   :  { %489 = vmatmul.bf16.gmra.mxu0 %v1129_v20  ;;  %529 = vmatmul.bf16.gmra.mxu1 %v1137_v21 }
  0x52   :  { %569 = vmatmul.bf16.gmra.mxu2 %v1145_v22  ;;  %609 = vmatmul.bf16.gmra.mxu3 %v1153_v23 }
  0x61   :  { %494 = vmatmul.bf16.gmra.mxu0 %v1130_v24  ;;  %534 = vmatmul.bf16.gmra.mxu1 %v1138_v25 }
  0x62   :  { %574 = vmatmul.bf16.gmra.mxu2 %v1146_v26  ;;  %614 = vmatmul.bf16.gmra.mxu3 %v1154_v27 }
  0x71   :  { %499 = vmatmul.bf16.gmra.mxu0 %v1131_v28  ;;  %539 = vmatmul.bf16.gmra.mxu1 %v1139_v29 }
  0x72   :  { %579 = vmatmul.bf16.gmra.mxu2 %v1147_v30  ;;  %619 = vmatmul.bf16.gmra.mxu3 %v1155_v31 }
  0x81   :  { %504 = vmatmul.bf16.gmra.mxu0 %v1132_v32  ;;  %544 = vmatmul.bf16.gmra.mxu1 %v1140_v33 }
  0x82   :  { %584 = vmatmul.bf16.gmra.mxu2 %v1148_v34  ;;  %624 = vmatmul.bf16.gmra.mxu3 %v1156_v35 }
  0x91   :  { %509 = vmatmul.bf16.gmra.mxu0 %v1133_v36  ;;  %549 = vmatmul.bf16.gmra.mxu1 %v1141_v37 }
  0x92   :  { %589 = vmatmul.bf16.gmra.mxu2 %v1149_v38  ;;  %629 = vmatmul.bf16.gmra.mxu3 %v1157_v39 }
  0x9e   :  { %v475_v41 = vpop.f32.mrf.mxu0  ;;  %v515_v42 = vpop.f32.mrf.mxu1 }
  0x9f   :  { %v834_v43 = vadd.f32 %v1334_v40, %v475_v41  ;;  %v850_v44 = vadd.f32 %v1334_v40, %v515_v42 }
  0xa1   :  { %898 = vst [vmem:[%s1595_s3] sm:$0xff] %v834_v43 }
  0xa2   :  { %914 = vst [vmem:[%s1595_s3 + $0x80] sm:$0xff] %v850_v44 }
  0xa5   :  { %v555_v45 = vpop.f32.mrf.mxu2  ;;  %v595_v46 = vpop.f32.mrf.mxu3 }
  0xa6   :  { %v866_v47 = vadd.f32 %v1334_v40, %v555_v45  ;;  %v882_v48 = vadd.f32 %v1334_v40, %v595_v46  ;;  %v477_v49 = vpop.f32.mrf.mxu0  ;;  %v517_v50 = vpop.f32.mrf.mxu1 }
  0xa7   :  { %v835_v51 = vadd.f32 %v1334_v40, %v477_v49  ;;  %v851_v52 = vadd.f32 %v1334_v40, %v517_v50 }
  0xa8   :  { %930 = vst [vmem:[%s1595_s3 + $0x100] sm:$0xff] %v866_v47 }
  0xa9   :  { %946 = vst [vmem:[%s1595_s3 + $0x180] sm:$0xff] %v882_v48 }
  0xaa   :  { %899 = vst [vmem:[%s1595_s3 + $0x8] sm:$0xff] %v835_v51 }
  0xab   :  { %915 = vst [vmem:[%s1595_s3 + $0x88] sm:$0xff] %v851_v52 }
  0xad   :  { %v557_v53 = vpop.f32.mrf.mxu2  ;;  %v597_v54 = vpop.f32.mrf.mxu3 }
  0xae   :  { %v867_v55 = vadd.f32 %v1334_v40, %v557_v53  ;;  %v883_v56 = vadd.f32 %v1334_v40, %v597_v54  ;;  %v480_v57 = vpop.f32.mrf.mxu0  ;;  %v520_v58 = vpop.f32.mrf.mxu1 }
  0xaf   :  { %v836_v59 = vadd.f32 %v1334_v40, %v480_v57  ;;  %v852_v60 = vadd.f32 %v1334_v40, %v520_v58 }
  0xb0   :  { %931 = vst [vmem:[%s1595_s3 + $0x108] sm:$0xff] %v867_v55 }
  0xb1   :  { %947 = vst [vmem:[%s1595_s3 + $0x188] sm:$0xff] %v883_v56 }
  0xb2   :  { %900 = vst [vmem:[%s1595_s3 + $0x10] sm:$0xff] %v836_v59 }
  0xb3   :  { %916 = vst [vmem:[%s1595_s3 + $0x90] sm:$0xff] %v852_v60 }
  0xb5   :  { %v560_v61 = vpop.f32.mrf.mxu2  ;;  %v600_v62 = vpop.f32.mrf.mxu3 }
  0xb6   :  { %v868_v63 = vadd.f32 %v1334_v40, %v560_v61  ;;  %v884_v0 = vadd.f32 %v1334_v40, %v600_v62  ;;  %v482_v1 = vpop.f32.mrf.mxu0  ;;  %v522_v2 = vpop.f32.mrf.mxu1 }
  0xb7   :  { %v837_v3 = vadd.f32 %v1334_v40, %v482_v1  ;;  %v853_v4 = vadd.f32 %v1334_v40, %v522_v2 }
  0xb8   :  { %932 = vst [vmem:[%s1595_s3 + $0x110] sm:$0xff] %v868_v63 }
  0xb9   :  { %948 = vst [vmem:[%s1595_s3 + $0x190] sm:$0xff] %v884_v0 }
  0xba   :  { %901 = vst [vmem:[%s1595_s3 + $0x18] sm:$0xff] %v837_v3 }
  0xbb   :  { %917 = vst [vmem:[%s1595_s3 + $0x98] sm:$0xff] %v853_v4 }
  0xbd   :  { %v562_v5 = vpop.f32.mrf.mxu2  ;;  %v602_v6 = vpop.f32.mrf.mxu3 }
  0xbe   :  { %v869_v7 = vadd.f32 %v1334_v40, %v562_v5  ;;  %v885_v8 = vadd.f32 %v1334_v40, %v602_v6  ;;  %v485_v9 = vpop.f32.mrf.mxu0  ;;  %v525_v10 = vpop.f32.mrf.mxu1 }
  0xbf   :  { %v838_v11 = vadd.f32 %v1334_v40, %v485_v9  ;;  %v854_v12 = vadd.f32 %v1334_v40, %v525_v10 }
  0xc0   :  { %933 = vst [vmem:[%s1595_s3 + $0x118] sm:$0xff] %v869_v7 }
  0xc1   :  { %949 = vst [vmem:[%s1595_s3 + $0x198] sm:$0xff] %v885_v8 }
  0xc2   :  { %902 = vst [vmem:[%s1595_s3 + $0x20] sm:$0xff] %v838_v11 }
  0xc3   :  { %918 = vst [vmem:[%s1595_s3 + $0xa0] sm:$0xff] %v854_v12 }
  0xc5   :  { %v565_v13 = vpop.f32.mrf.mxu2  ;;  %v605_v14 = vpop.f32.mrf.mxu3 }
  0xc6   :  { %v870_v15 = vadd.f32 %v1334_v40, %v565_v13  ;;  %v886_v16 = vadd.f32 %v1334_v40, %v605_v14  ;;  %v487_v17 = vpop.f32.mrf.mxu0  ;;  %v527_v18 = vpop.f32.mrf.mxu1 }
  0xc7   :  { %v839_v19 = vadd.f32 %v1334_v40, %v487_v17  ;;  %v855_v20 = vadd.f32 %v1334_v40, %v527_v18 }
  0xc8   :  { %934 = vst [vmem:[%s1595_s3 + $0x120] sm:$0xff] %v870_v15 }
  0xc9   :  { %950 = vst [vmem:[%s1595_s3 + $0x1a0] sm:$0xff] %v886_v16 }
  0xca   :  { %903 = vst [vmem:[%s1595_s3 + $0x28] sm:$0xff] %v839_v19 }
  0xcb   :  { %919 = vst [vmem:[%s1595_s3 + $0xa8] sm:$0xff] %v855_v20 }
  0xcd   :  { %v567_v21 = vpop.f32.mrf.mxu2  ;;  %v607_v22 = vpop.f32.mrf.mxu3 }
  0xce   :  { %v871_v23 = vadd.f32 %v1334_v40, %v567_v21  ;;  %v887_v24 = vadd.f32 %v1334_v40, %v607_v22  ;;  %v490_v25 = vpop.f32.mrf.mxu0  ;;  %v530_v26 = vpop.f32.mrf.mxu1 }
  0xcf   :  { %v840_v27 = vadd.f32 %v1334_v40, %v490_v25  ;;  %v856_v28 = vadd.f32 %v1334_v40, %v530_v26 }
  0xd0   :  { %935 = vst [vmem:[%s1595_s3 + $0x128] sm:$0xff] %v871_v23 }
  0xd1   :  { %951 = vst [vmem:[%s1595_s3 + $0x1a8] sm:$0xff] %v887_v24 }
  0xd2   :  { %904 = vst [vmem:[%s1595_s3 + $0x30] sm:$0xff] %v840_v27 }
  0xd3   :  { %920 = vst [vmem:[%s1595_s3 + $0xb0] sm:$0xff] %v856_v28 }
  0xd5   :  { %v570_v29 = vpop.f32.mrf.mxu2  ;;  %v610_v30 = vpop.f32.mrf.mxu3 }
  0xd6   :  { %v872_v31 = vadd.f32 %v1334_v40, %v570_v29  ;;  %v888_v32 = vadd.f32 %v1334_v40, %v610_v30  ;;  %v492_v33 = vpop.f32.mrf.mxu0  ;;  %v532_v34 = vpop.f32.mrf.mxu1 }
  0xd7   :  { %v841_v35 = vadd.f32 %v1334_v40, %v492_v33  ;;  %v857_v36 = vadd.f32 %v1334_v40, %v532_v34 }
  0xd8   :  { %936 = vst [vmem:[%s1595_s3 + $0x130] sm:$0xff] %v872_v31 }
  0xd9   :  { %952 = vst [vmem:[%s1595_s3 + $0x1b0] sm:$0xff] %v888_v32 }
  0xda   :  { %905 = vst [vmem:[%s1595_s3 + $0x38] sm:$0xff] %v841_v35 }
  0xdb   :  { %921 = vst [vmem:[%s1595_s3 + $0xb8] sm:$0xff] %v857_v36 }
  0xdd   :  { %v572_v37 = vpop.f32.mrf.mxu2  ;;  %v612_v38 = vpop.f32.mrf.mxu3 }
  0xde   :  { %v873_v39 = vadd.f32 %v1334_v40, %v572_v37  ;;  %v889_v41 = vadd.f32 %v1334_v40, %v612_v38  ;;  %v495_v42 = vpop.f32.mrf.mxu0  ;;  %v535_v43 = vpop.f32.mrf.mxu1 }
  0xdf   :  { %v842_v44 = vadd.f32 %v1334_v40, %v495_v42  ;;  %v858_v45 = vadd.f32 %v1334_v40, %v535_v43 }
  0xe0   :  { %937 = vst [vmem:[%s1595_s3 + $0x138] sm:$0xff] %v873_v39 }
  0xe1   :  { %953 = vst [vmem:[%s1595_s3 + $0x1b8] sm:$0xff] %v889_v41 }
  0xe2   :  { %906 = vst [vmem:[%s1595_s3 + $0x40] sm:$0xff] %v842_v44 }
  0xe3   :  { %922 = vst [vmem:[%s1595_s3 + $0xc0] sm:$0xff] %v858_v45 }
  0xe5   :  { %v575_v46 = vpop.f32.mrf.mxu2  ;;  %v615_v47 = vpop.f32.mrf.mxu3 }
  0xe6   :  { %v874_v48 = vadd.f32 %v1334_v40, %v575_v46  ;;  %v890_v49 = vadd.f32 %v1334_v40, %v615_v47  ;;  %v497_v50 = vpop.f32.mrf.mxu0  ;;  %v537_v51 = vpop.f32.mrf.mxu1 }
  0xe7   :  { %v843_v52 = vadd.f32 %v1334_v40, %v497_v50  ;;  %v859_v53 = vadd.f32 %v1334_v40, %v537_v51 }
  0xe8   :  { %938 = vst [vmem:[%s1595_s3 + $0x140] sm:$0xff] %v874_v48 }
  0xe9   :  { %954 = vst [vmem:[%s1595_s3 + $0x1c0] sm:$0xff] %v890_v49 }
  0xea   :  { %907 = vst [vmem:[%s1595_s3 + $0x48] sm:$0xff] %v843_v52 }
  0xeb   :  { %923 = vst [vmem:[%s1595_s3 + $0xc8] sm:$0xff] %v859_v53 }
  0xed   :  { %v577_v54 = vpop.f32.mrf.mxu2  ;;  %v617_v55 = vpop.f32.mrf.mxu3 }
  0xee   :  { %v875_v56 = vadd.f32 %v1334_v40, %v577_v54  ;;  %v891_v57 = vadd.f32 %v1334_v40, %v617_v55  ;;  %v500_v58 = vpop.f32.mrf.mxu0  ;;  %v540_v59 = vpop.f32.mrf.mxu1 }
  0xef   :  { %v844_v60 = vadd.f32 %v1334_v40, %v500_v58  ;;  %v860_v61 = vadd.f32 %v1334_v40, %v540_v59 }
  0xf0   :  { %939 = vst [vmem:[%s1595_s3 + $0x148] sm:$0xff] %v875_v56 }
  0xf1   :  { %955 = vst [vmem:[%s1595_s3 + $0x1c8] sm:$0xff] %v891_v57 }
  0xf2   :  { %908 = vst [vmem:[%s1595_s3 + $0x50] sm:$0xff] %v844_v60 }
  0xf3   :  { %924 = vst [vmem:[%s1595_s3 + $0xd0] sm:$0xff] %v860_v61 }
  0xf5   :  { %v580_v62 = vpop.f32.mrf.mxu2  ;;  %v620_v63 = vpop.f32.mrf.mxu3 }
  0xf6   :  { %v876_v0 = vadd.f32 %v1334_v40, %v580_v62  ;;  %v892_v1 = vadd.f32 %v1334_v40, %v620_v63  ;;  %v502_v2 = vpop.f32.mrf.mxu0  ;;  %v542_v3 = vpop.f32.mrf.mxu1 }
  0xf7   :  { %v845_v4 = vadd.f32 %v1334_v40, %v502_v2  ;;  %v861_v5 = vadd.f32 %v1334_v40, %v542_v3 }
  0xf8   :  { %940 = vst [vmem:[%s1595_s3 + $0x150] sm:$0xff] %v876_v0 }
  0xf9   :  { %956 = vst [vmem:[%s1595_s3 + $0x1d0] sm:$0xff] %v892_v1 }
  0xfa   :  { %909 = vst [vmem:[%s1595_s3 + $0x58] sm:$0xff] %v845_v4 }
  0xfb   :  { %925 = vst [vmem:[%s1595_s3 + $0xd8] sm:$0xff] %v861_v5 }
  0xfd   :  { %v582_v6 = vpop.f32.mrf.mxu2  ;;  %v622_v7 = vpop.f32.mrf.mxu3 }
  0xfe   :  { %v877_v8 = vadd.f32 %v1334_v40, %v582_v6  ;;  %v893_v9 = vadd.f32 %v1334_v40, %v622_v7  ;;  %v505_v10 = vpop.f32.mrf.mxu0  ;;  %v545_v11 = vpop.f32.mrf.mxu1 }
  0xff   :  { %v846_v12 = vadd.f32 %v1334_v40, %v505_v10  ;;  %v862_v13 = vadd.f32 %v1334_v40, %v545_v11 }
 0x100   :  { %941 = vst [vmem:[%s1595_s3 + $0x158] sm:$0xff] %v877_v8 }
 0x101   :  { %957 = vst [vmem:[%s1595_s3 + $0x1d8] sm:$0xff] %v893_v9 }
 0x102   :  { %910 = vst [vmem:[%s1595_s3 + $0x60] sm:$0xff] %v846_v12 }
 0x103   :  { %926 = vst [vmem:[%s1595_s3 + $0xe0] sm:$0xff] %v862_v13 }
 0x105   :  { %v585_v14 = vpop.f32.mrf.mxu2  ;;  %v625_v15 = vpop.f32.mrf.mxu3 }
 0x106   :  { %v878_v16 = vadd.f32 %v1334_v40, %v585_v14  ;;  %v894_v17 = vadd.f32 %v1334_v40, %v625_v15  ;;  %v507_v18 = vpop.f32.mrf.mxu0  ;;  %v547_v19 = vpop.f32.mrf.mxu1 }
 0x107   :  { %v847_v20 = vadd.f32 %v1334_v40, %v507_v18  ;;  %v863_v21 = vadd.f32 %v1334_v40, %v547_v19 }
 0x108   :  { %942 = vst [vmem:[%s1595_s3 + $0x160] sm:$0xff] %v878_v16 }
 0x109   :  { %958 = vst [vmem:[%s1595_s3 + $0x1e0] sm:$0xff] %v894_v17 }
 0x10a   :  { %911 = vst [vmem:[%s1595_s3 + $0x68] sm:$0xff] %v847_v20 }
 0x10b   :  { %927 = vst [vmem:[%s1595_s3 + $0xe8] sm:$0xff] %v863_v21 }
 0x10d   :  { %v587_v22 = vpop.f32.mrf.mxu2  ;;  %v627_v23 = vpop.f32.mrf.mxu3 }
 0x10e   :  { %v879_v24 = vadd.f32 %v1334_v40, %v587_v22  ;;  %v895_v25 = vadd.f32 %v1334_v40, %v627_v23  ;;  %v510_v26 = vpop.f32.mrf.mxu0  ;;  %v550_v27 = vpop.f32.mrf.mxu1 }
 0x10f   :  { %v848_v28 = vadd.f32 %v1334_v40, %v510_v26  ;;  %v864_v29 = vadd.f32 %v1334_v40, %v550_v27 }
 0x110   :  { %943 = vst [vmem:[%s1595_s3 + $0x168] sm:$0xff] %v879_v24 }
 0x111   :  { %959 = vst [vmem:[%s1595_s3 + $0x1e8] sm:$0xff] %v895_v25 }
 0x112   :  { %912 = vst [vmem:[%s1595_s3 + $0x70] sm:$0xff] %v848_v28 }
 0x113   :  { %928 = vst [vmem:[%s1595_s3 + $0xf0] sm:$0xff] %v864_v29 }
 0x115   :  { %v590_v30 = vpop.f32.mrf.mxu2  ;;  %v630_v31 = vpop.f32.mrf.mxu3 }
 0x116   :  { %v880_v32 = vadd.f32 %v1334_v40, %v590_v30  ;;  %v896_v33 = vadd.f32 %v1334_v40, %v630_v31  ;;  %v512_v34 = vpop.f32.mrf.mxu0  ;;  %v552_v35 = vpop.f32.mrf.mxu1 }
 0x117   :  { %v849_v36 = vadd.f32 %v1334_v40, %v512_v34  ;;  %v865_v37 = vadd.f32 %v1334_v40, %v552_v35 }
 0x118   :  { %944 = vst [vmem:[%s1595_s3 + $0x170] sm:$0xff] %v880_v32 }
 0x119   :  { %960 = vst [vmem:[%s1595_s3 + $0x1f0] sm:$0xff] %v896_v33 }
 0x11a   :  { %913 = vst [vmem:[%s1595_s3 + $0x78] sm:$0xff] %v849_v36 }
 0x11b   :  { %929 = vst [vmem:[%s1595_s3 + $0xf8] sm:$0xff] %v865_v37 }
 0x11d   :  { %v592_v38 = vpop.f32.mrf.mxu2  ;;  %v632_v39 = vpop.f32.mrf.mxu3 }
 0x11e   :  { %v881_v41 = vadd.f32 %v1334_v40, %v592_v38  ;;  %v897_v42 = vadd.f32 %v1334_v40, %v632_v39 }
 0x120   :  { %945 = vst [vmem:[%s1595_s3 + $0x178] sm:$0xff] %v881_v41 }
 0x121   :  { %961 = vst [vmem:[%s1595_s3 + $0x1f8] sm:$0xff] %v897_v42 }

// kernel: extras_forward_pallas.9
= control target key start
LH: loop header
LB: loop body
LE: loop exit
PB: predicated region body
PF: predicated region fallthrough
CT: control target
= control target key end

     0   :  { %s755_s1 = inlined_call_operand.vmem [shape: bf16[128,128], index: 1, kind: input, shape index: {}]   ;;  %s756_s2 = inlined_call_operand.vmem [shape: f32[1,128], index: 2, kind: input, shape index: {}]   ;;  %s757_s0 = inlined_call_operand.vmem [shape: bf16[200,128], index: 0, kind: input, shape index: {}]   ;;  %s758_s3 = inlined_call_operand.vmem [shape: f32[200,128], index: 3, kind: output, shape index: {}]  }
   0x1   :  { %v541_v0 = vld [vmem:[%s755_s1 + $0x38] sm:$0xff]  ;;  %v540_v1 = vld [vmem:[%s755_s1 + $0x30] sm:$0xff]  ;;  %v539_v2 = vld [vmem:[%s755_s1 + $0x28] sm:$0xff] }
   0x2   :  { %543 = vmatpush.bf16.msra.mxu2 %v541_v0  ;;  %544 = vmatpush.bf16.msra.mxu3 %v541_v0  ;;  %v538_v3 = vld [vmem:[%s755_s1 + $0x20] sm:$0xff]  ;;  %v537_v4 = vld [vmem:[%s755_s1 + $0x18] sm:$0xff]  ;;  %v536_v5 = vld [vmem:[%s755_s1 + $0x10] sm:$0xff] }
   0x3   :  { %233 = vmatpush.bf16.msra.mxu0 %v541_v0  ;;  %542 = vmatpush.bf16.msra.mxu1 %v541_v0  ;;  %v535_v6 = vld [vmem:[%s755_s1 + $0x8] sm:$0xff]  ;;  %v534_v7 = vld [vmem:[%s755_s1] sm:$0xff]  ;;  %v528_v8 = vld [vmem:[%s757_s0 + $0x30] sm:$0xff] }
   0x4   :  { %v532_v9 = vld [vmem:[%s757_s0 + $0x50] sm:$0xff]  ;;  %v522_v10 = vld [vmem:[%s757_s0] sm:$0xff]  ;;  %v525_v11 = vld [vmem:[%s757_s0 + $0x18] sm:$0xff] }
   0x5   :  { %v529_v12 = vld [vmem:[%s757_s0 + $0x38] sm:$0xff]  ;;  %v523_v14 = vld [vmem:[%s757_s0 + $0x8] sm:$0xff]  ;;  %v526_v15 = vld [vmem:[%s757_s0 + $0x20] sm:$0xff] }
   0x6   :  { %546 = vmatpush.bf16.msra.mxu2 %v540_v1  ;;  %547 = vmatpush.bf16.msra.mxu3 %v540_v1  ;;  %v533_v13 = vld [vmem:[%s757_s0 + $0x58] sm:$0xff]  ;;  %v92_v16 = vld [vmem:[%s757_s0 + $0x60] sm:$0xf]  ;;  %v524_v20 = vld [vmem:[%s757_s0 + $0x10] sm:$0xff] }
   0x7   :  { %234 = vmatpush.bf16.msra.mxu0 %v540_v1  ;;  %545 = vmatpush.bf16.msra.mxu1 %v540_v1  ;;  %v158_v17 = vunpack.c.l.b16 %v92_v16  ;;  %v530_v18 = vld [vmem:[%s757_s0 + $0x40] sm:$0xff]  ;;  %v527_v21 = vld [vmem:[%s757_s0 + $0x28] sm:$0xff] }
   0x8   :  { %v531_v22 = vld [vmem:[%s757_s0 + $0x48] sm:$0xff]  ;;  %v653_v23 = vld [vmem:[%s756_s2] ss:$0 sm:$0xff] }
   0x9   :  { %v171_v19 = vpack.c.b16 %v158_v17, %v158_v17 }
   0xa   :  { %549 = vmatpush.bf16.msra.mxu2 %v539_v2  ;;  %550 = vmatpush.bf16.msra.mxu3 %v539_v2 }
   0xb   :  { %235 = vmatpush.bf16.msra.mxu0 %v539_v2  ;;  %548 = vmatpush.bf16.msra.mxu1 %v539_v2 }
   0xe   :  { %552 = vmatpush.bf16.msra.mxu2 %v538_v3  ;;  %553 = vmatpush.bf16.msra.mxu3 %v538_v3 }
   0xf   :  { %236 = vmatpush.bf16.msra.mxu0 %v538_v3  ;;  %551 = vmatpush.bf16.msra.mxu1 %v538_v3 }
  0x12   :  { %555 = vmatpush.bf16.msra.mxu2 %v537_v4  ;;  %556 = vmatpush.bf16.msra.mxu3 %v537_v4 }
  0x13   :  { %237 = vmatpush.bf16.msra.mxu0 %v537_v4  ;;  %554 = vmatpush.bf16.msra.mxu1 %v537_v4 }
  0x16   :  { %558 = vmatpush.bf16.msra.mxu2 %v536_v5  ;;  %559 = vmatpush.bf16.msra.mxu3 %v536_v5 }
  0x17   :  { %238 = vmatpush.bf16.msra.mxu0 %v536_v5  ;;  %557 = vmatpush.bf16.msra.mxu1 %v536_v5 }
  0x1a   :  { %561 = vmatpush.bf16.msra.mxu2 %v535_v6  ;;  %562 = vmatpush.bf16.msra.mxu3 %v535_v6 }
  0x1b   :  { %239 = vmatpush.bf16.msra.mxu0 %v535_v6  ;;  %560 = vmatpush.bf16.msra.mxu1 %v535_v6 }
  0x1e   :  { %564 = vmatpush.bf16.msra.mxu2 %v534_v7  ;;  %565 = vmatpush.bf16.msra.mxu3 %v534_v7 }
  0x1f   :  { %240 = vmatpush.bf16.msra.mxu0 %v534_v7  ;;  %563 = vmatpush.bf16.msra.mxu1 %v534_v7 }
  0x21   :  { %271 = vmatmul.bf16.vlgmr.msra.gmra.mxu2 %v528_v8  ;;  %291 = vmatmul.bf16.vlgmr.msra.gmra.mxu3 %v532_v9 }
  0x22   :  { %241 = vmatmul.bf16.vlgmr.msra.gmra.mxu0 %v522_v10  ;;  %256 = vmatmul.bf16.vlgmr.msra.gmra.mxu1 %v525_v11 }
  0x31   :  { %276 = vmatmul.bf16.gmra.mxu2 %v529_v12  ;;  %296 = vmatmul.bf16.gmra.mxu3 %v533_v13 }
  0x32   :  { %246 = vmatmul.bf16.gmra.mxu0 %v523_v14  ;;  %261 = vmatmul.bf16.gmra.mxu1 %v526_v15 }
  0x41   :  { %281 = vmatmul.bf16.gmra.mxu2 %v530_v18  ;;  %301 = vmatmul.bf16.gmra.mxu3 %v171_v19 }
  0x42   :  { %251 = vmatmul.bf16.gmra.mxu0 %v524_v20  ;;  %266 = vmatmul.bf16.gmra.mxu1 %v527_v21 }
  0x51   :  { %286 = vmatmul.bf16.gmra.mxu2 %v531_v22 }
  0x9f   :  { %v242_v24 = vpop.f32.mrf.mxu0  ;;  %v257_v25 = vpop.f32.mrf.mxu1 }
  0xa0   :  { %v388_v26 = vadd.f32 %v653_v23, %v242_v24  ;;  %v394_v27 = vadd.f32 %v653_v23, %v257_v25 }
  0xa2   :  { %413 = vst [vmem:[%s758_s3] sm:$0xff] %v388_v26 }
  0xa3   :  { %419 = vst [vmem:[%s758_s3 + $0x30] sm:$0xff] %v394_v27 }
  0xa4   :  { %v272_v28 = vpop.f32.mrf.mxu2  ;;  %v292_v29 = vpop.f32.mrf.mxu3 }
  0xa5   :  { %v400_v30 = vadd.f32 %v653_v23, %v272_v28  ;;  %v408_v31 = vadd.f32 %v653_v23, %v292_v29 }
  0xa7   :  { %425 = vst [vmem:[%s758_s3 + $0x60] sm:$0xff] %v400_v30  ;;  %v244_v32 = vpop.f32.mrf.mxu0  ;;  %v259_v33 = vpop.f32.mrf.mxu1 }
  0xa8   :  { %433 = vst [vmem:[%s758_s3 + $0xa0] sm:$0xff] %v408_v31  ;;  %v389_v34 = vadd.f32 %v653_v23, %v244_v32  ;;  %v395_v35 = vadd.f32 %v653_v23, %v259_v33 }
  0xaa   :  { %414 = vst [vmem:[%s758_s3 + $0x8] sm:$0xff] %v389_v34 }
  0xab   :  { %420 = vst [vmem:[%s758_s3 + $0x38] sm:$0xff] %v395_v35 }
  0xac   :  { %v274_v36 = vpop.f32.mrf.mxu2  ;;  %v294_v37 = vpop.f32.mrf.mxu3 }
  0xad   :  { %v401_v38 = vadd.f32 %v653_v23, %v274_v36  ;;  %v409_v39 = vadd.f32 %v653_v23, %v294_v37 }
  0xaf   :  { %426 = vst [vmem:[%s758_s3 + $0x68] sm:$0xff] %v401_v38  ;;  %v247_v40 = vpop.f32.mrf.mxu0  ;;  %v262_v41 = vpop.f32.mrf.mxu1 }
  0xb0   :  { %434 = vst [vmem:[%s758_s3 + $0xa8] sm:$0xff] %v409_v39  ;;  %v390_v42 = vadd.f32 %v653_v23, %v247_v40  ;;  %v396_v43 = vadd.f32 %v653_v23, %v262_v41 }
  0xb2   :  { %415 = vst [vmem:[%s758_s3 + $0x10] sm:$0xff] %v390_v42 }
  0xb3   :  { %421 = vst [vmem:[%s758_s3 + $0x40] sm:$0xff] %v396_v43 }
  0xb4   :  { %v277_v44 = vpop.f32.mrf.mxu2  ;;  %v297_v45 = vpop.f32.mrf.mxu3 }
  0xb5   :  { %v402_v46 = vadd.f32 %v653_v23, %v277_v44  ;;  %v410_v47 = vadd.f32 %v653_v23, %v297_v45 }
  0xb7   :  { %427 = vst [vmem:[%s758_s3 + $0x70] sm:$0xff] %v402_v46  ;;  %v249_v48 = vpop.f32.mrf.mxu0  ;;  %v264_v49 = vpop.f32.mrf.mxu1 }
  0xb8   :  { %435 = vst [vmem:[%s758_s3 + $0xb0] sm:$0xff] %v410_v47  ;;  %v391_v50 = vadd.f32 %v653_v23, %v249_v48  ;;  %v397_v51 = vadd.f32 %v653_v23, %v264_v49 }
  0xba   :  { %416 = vst [vmem:[%s758_s3 + $0x18] sm:$0xff] %v391_v50 }
  0xbb   :  { %422 = vst [vmem:[%s758_s3 + $0x48] sm:$0xff] %v397_v51 }
  0xbc   :  { %v279_v52 = vpop.f32.mrf.mxu2  ;;  %v299_v53 = vpop.f32.mrf.mxu3 }
  0xbd   :  { %v403_v54 = vadd.f32 %v653_v23, %v279_v52  ;;  %v411_v55 = vadd.f32 %v653_v23, %v299_v53 }
  0xbf   :  { %428 = vst [vmem:[%s758_s3 + $0x78] sm:$0xff] %v403_v54  ;;  %v252_v56 = vpop.f32.mrf.mxu0  ;;  %v267_v57 = vpop.f32.mrf.mxu1 }
  0xc0   :  { %436 = vst [vmem:[%s758_s3 + $0xb8] sm:$0xff] %v411_v55  ;;  %v392_v58 = vadd.f32 %v653_v23, %v252_v56  ;;  %v398_v59 = vadd.f32 %v653_v23, %v267_v57 }
  0xc2   :  { %417 = vst [vmem:[%s758_s3 + $0x20] sm:$0xff] %v392_v58 }
  0xc3   :  { %423 = vst [vmem:[%s758_s3 + $0x50] sm:$0xff] %v398_v59 }
  0xc4   :  { %v282_v60 = vpop.f32.mrf.mxu2  ;;  %v302_v61 = vpop.f32.mrf.mxu3 }
  0xc5   :  { %v404_v62 = vadd.f32 %v653_v23, %v282_v60  ;;  %v412_v63 = vadd.f32 %v653_v23, %v302_v61 }
  0xc7   :  { %429 = vst [vmem:[%s758_s3 + $0x80] sm:$0xff] %v404_v62  ;;  %v254_v0 = vpop.f32.mrf.mxu0  ;;  %v269_v1 = vpop.f32.mrf.mxu1 }
  0xc8   :  { %437 = vst [vmem:[%s758_s3 + $0xc0] sm:$0xff] %v412_v63  ;;  %v393_v2 = vadd.f32 %v653_v23, %v254_v0  ;;  %v399_v3 = vadd.f32 %v653_v23, %v269_v1 }
  0xca   :  { %418 = vst [vmem:[%s758_s3 + $0x28] sm:$0xff] %v393_v2 }
  0xcb   :  { %424 = vst [vmem:[%s758_s3 + $0x58] sm:$0xff] %v399_v3 }
  0xcc   :  { %v284_v4 = vpop.f32.mrf.mxu2  ;;  %v304_v5 = vpop.f32.mrf.mxu3 }
  0xcd   :  { %v405_v6 = vadd.f32 %v653_v23, %v284_v4 }
  0xcf   :  { %430 = vst [vmem:[%s758_s3 + $0x88] sm:$0xff] %v405_v6 }
  0xd4   :  { %v287_v7 = vpop.f32.mrf.mxu2 }
  0xd5   :  { %v406_v8 = vadd.f32 %v653_v23, %v287_v7 }
  0xd7   :  { %431 = vst [vmem:[%s758_s3 + $0x90] sm:$0xff] %v406_v8 }
  0xdc   :  { %v289_v9 = vpop.f32.mrf.mxu2 }
  0xdd   :  { %v407_v10 = vadd.f32 %v653_v23, %v289_v9 }
  0xdf   :  { %432 = vst [vmem:[%s758_s3 + $0x98] sm:$0xff] %v407_v10 }

// kernel: extras_forward_pallas.11
= control target key start
LH: loop header
LB: loop body
LE: loop exit
PB: predicated region body
PF: predicated region fallthrough
CT: control target
= control target key end

     0   :  { %s359_s1 = inlined_call_operand.vmem [shape: bf16[128,128], index: 1, kind: input, shape index: {}]   ;;  %s360_s2 = inlined_call_operand.vmem [shape: f32[1,128], index: 2, kind: input, shape index: {}]   ;;  %s361_s0 = inlined_call_operand.vmem [shape: bf16[56,128], index: 0, kind: input, shape index: {}]   ;;  %s362_s3 = inlined_call_operand.vmem [shape: f32[56,128], index: 3, kind: output, shape index: {}]  }
   0x1   :  { %v253_v0 = vld [vmem:[%s359_s1 + $0x38] sm:$0xff]  ;;  %v252_v1 = vld [vmem:[%s359_s1 + $0x30] sm:$0xff]  ;;  %v251_v2 = vld [vmem:[%s359_s1 + $0x28] sm:$0xff] }
   0x2   :  { %125 = vmatpush.bf16.msra.mxu0 %v253_v0  ;;  %254 = vmatpush.bf16.msra.mxu1 %v253_v0  ;;  %v250_v3 = vld [vmem:[%s359_s1 + $0x20] sm:$0xff]  ;;  %v249_v4 = vld [vmem:[%s359_s1 + $0x18] sm:$0xff]  ;;  %v248_v5 = vld [vmem:[%s359_s1 + $0x10] sm:$0xff] }
   0x3   :  { %255 = vmatpush.bf16.msra.mxu2 %v253_v0  ;;  %256 = vmatpush.bf16.msra.mxu3 %v253_v0  ;;  %v247_v6 = vld [vmem:[%s359_s1 + $0x8] sm:$0xff]  ;;  %v38_v7 = vld [vmem:[%s361_s0 + $0x18] sm:$0xf]  ;;  %v246_v8 = vld [vmem:[%s359_s1] sm:$0xff] }
   0x4   :  { %v68_v9 = vunpack.c.l.b16 %v38_v7  ;;  %v243_v10 = vld [vmem:[%s361_s0] sm:$0xff]  ;;  %v244_v11 = vld [vmem:[%s361_s0 + $0x8] sm:$0xff]  ;;  %v245_v12 = vld [vmem:[%s361_s0 + $0x10] sm:$0xff] }
   0x5   :  { %v278_v14 = vld [vmem:[%s360_s2] ss:$0 sm:$0xff] }
   0x6   :  { %126 = vmatpush.bf16.msra.mxu0 %v252_v1  ;;  %257 = vmatpush.bf16.msra.mxu1 %v252_v1  ;;  %v72_v13 = vpack.c.b16 %v68_v9, %v68_v9 }
   0x7   :  { %258 = vmatpush.bf16.msra.mxu2 %v252_v1  ;;  %259 = vmatpush.bf16.msra.mxu3 %v252_v1 }
   0xa   :  { %127 = vmatpush.bf16.msra.mxu0 %v251_v2  ;;  %260 = vmatpush.bf16.msra.mxu1 %v251_v2 }
   0xb   :  { %261 = vmatpush.bf16.msra.mxu2 %v251_v2  ;;  %262 = vmatpush.bf16.msra.mxu3 %v251_v2 }
   0xe   :  { %128 = vmatpush.bf16.msra.mxu0 %v250_v3  ;;  %263 = vmatpush.bf16.msra.mxu1 %v250_v3 }
   0xf   :  { %264 = vmatpush.bf16.msra.mxu2 %v250_v3  ;;  %265 = vmatpush.bf16.msra.mxu3 %v250_v3 }
  0x12   :  { %129 = vmatpush.bf16.msra.mxu0 %v249_v4  ;;  %266 = vmatpush.bf16.msra.mxu1 %v249_v4 }
  0x13   :  { %267 = vmatpush.bf16.msra.mxu2 %v249_v4  ;;  %268 = vmatpush.bf16.msra.mxu3 %v249_v4 }
  0x16   :  { %130 = vmatpush.bf16.msra.mxu0 %v248_v5  ;;  %269 = vmatpush.bf16.msra.mxu1 %v248_v5 }
  0x17   :  { %270 = vmatpush.bf16.msra.mxu2 %v248_v5  ;;  %271 = vmatpush.bf16.msra.mxu3 %v248_v5 }
  0x1a   :  { %131 = vmatpush.bf16.msra.mxu0 %v247_v6  ;;  %272 = vmatpush.bf16.msra.mxu1 %v247_v6 }
  0x1b   :  { %273 = vmatpush.bf16.msra.mxu2 %v247_v6  ;;  %274 = vmatpush.bf16.msra.mxu3 %v247_v6 }
  0x1e   :  { %132 = vmatpush.bf16.msra.mxu0 %v246_v8  ;;  %275 = vmatpush.bf16.msra.mxu1 %v246_v8 }
  0x1f   :  { %276 = vmatpush.bf16.msra.mxu2 %v246_v8  ;;  %277 = vmatpush.bf16.msra.mxu3 %v246_v8 }
  0x21   :  { %133 = vmatmul.bf16.vlgmr.msra.gmra.mxu0 %v243_v10  ;;  %138 = vmatmul.bf16.vlgmr.msra.gmra.mxu1 %v244_v11 }
  0x22   :  { %143 = vmatmul.bf16.vlgmr.msra.gmra.mxu2 %v245_v12  ;;  %148 = vmatmul.bf16.vlgmr.msra.gmra.mxu3 %v72_v13 }
  0x9e   :  { %v134_v15 = vpop.f32.mrf.mxu0  ;;  %v139_v16 = vpop.f32.mrf.mxu1 }
  0x9f   :  { %v181_v17 = vadd.f32 %v278_v14, %v134_v15  ;;  %v183_v18 = vadd.f32 %v278_v14, %v139_v16 }
  0xa1   :  { %188 = vst [vmem:[%s362_s3] sm:$0xff] %v181_v17 }
  0xa2   :  { %190 = vst [vmem:[%s362_s3 + $0x10] sm:$0xff] %v183_v18 }
  0xa5   :  { %v144_v19 = vpop.f32.mrf.mxu2  ;;  %v149_v20 = vpop.f32.mrf.mxu3 }
  0xa6   :  { %v185_v21 = vadd.f32 %v278_v14, %v144_v19  ;;  %v187_v22 = vadd.f32 %v278_v14, %v149_v20  ;;  %v136_v23 = vpop.f32.mrf.mxu0  ;;  %v141_v24 = vpop.f32.mrf.mxu1 }
  0xa7   :  { %v182_v25 = vadd.f32 %v278_v14, %v136_v23  ;;  %v184_v26 = vadd.f32 %v278_v14, %v141_v24 }
  0xa8   :  { %192 = vst [vmem:[%s362_s3 + $0x20] sm:$0xff] %v185_v21 }
  0xa9   :  { %194 = vst [vmem:[%s362_s3 + $0x30] sm:$0xff] %v187_v22 }
  0xaa   :  { %189 = vst [vmem:[%s362_s3 + $0x8] sm:$0xff] %v182_v25 }
  0xab   :  { %191 = vst [vmem:[%s362_s3 + $0x18] sm:$0xff] %v184_v26 }
  0xad   :  { %v146_v27 = vpop.f32.mrf.mxu2  ;;  %v151_v28 = vpop.f32.mrf.mxu3 }
  0xae   :  { %v186_v29 = vadd.f32 %v278_v14, %v146_v27 }
  0xb0   :  { %193 = vst [vmem:[%s362_s3 + $0x28] sm:$0xff] %v186_v29 }

// kernel: extras_forward_pallas.13
= control target key start
LH: loop header
LB: loop body
LE: loop exit
PB: predicated region body
PF: predicated region fallthrough
CT: control target
= control target key end

     0   :  { %s261_s1 = inlined_call_operand.vmem [shape: bf16[128,128], index: 1, kind: input, shape index: {}]   ;;  %s262_s2 = inlined_call_operand.vmem [shape: f32[1,128], index: 2, kind: input, shape index: {}]   ;;  %s263_s0 = inlined_call_operand.vmem [shape: bf16[24,128], index: 0, kind: input, shape index: {}]   ;;  %s264_s3 = inlined_call_operand.vmem [shape: f32[24,128], index: 3, kind: output, shape index: {}]  }
   0x1   :  { %v189_v0 = vld [vmem:[%s261_s1 + $0x38] sm:$0xff]  ;;  %v188_v1 = vld [vmem:[%s261_s1 + $0x30] sm:$0xff]  ;;  %v187_v2 = vld [vmem:[%s261_s1 + $0x28] sm:$0xff] }
   0x2   :  { %101 = vmatpush.bf16.msra.mxu0 %v189_v0  ;;  %190 = vmatpush.bf16.msra.mxu1 %v189_v0  ;;  %v186_v3 = vld [vmem:[%s261_s1 + $0x20] sm:$0xff]  ;;  %v185_v4 = vld [vmem:[%s261_s1 + $0x18] sm:$0xff]  ;;  %v184_v5 = vld [vmem:[%s261_s1 + $0x10] sm:$0xff] }
   0x3   :  { %v183_v6 = vld [vmem:[%s261_s1 + $0x8] sm:$0xff]  ;;  %v182_v9 = vld [vmem:[%s261_s1] sm:$0xff] }
   0x4   :  { %v26_v7 = vld [vmem:[%s263_s0 + $0x8] sm:$0xf]  ;;  %v181_v10 = vld [vmem:[%s263_s0] sm:$0xff] }
   0x5   :  { %v48_v8 = vunpack.c.l.b16 %v26_v7  ;;  %v198_v12 = vld [vmem:[%s262_s2] ss:$0 sm:$0xff] }
   0x6   :  { %102 = vmatpush.bf16.msra.mxu0 %v188_v1  ;;  %191 = vmatpush.bf16.msra.mxu1 %v188_v1 }
   0x7   :  { %v50_v11 = vpack.c.b16 %v48_v8, %v48_v8 }
   0xa   :  { %103 = vmatpush.bf16.msra.mxu0 %v187_v2  ;;  %192 = vmatpush.bf16.msra.mxu1 %v187_v2 }
   0xe   :  { %104 = vmatpush.bf16.msra.mxu0 %v186_v3  ;;  %193 = vmatpush.bf16.msra.mxu1 %v186_v3 }
  0x12   :  { %105 = vmatpush.bf16.msra.mxu0 %v185_v4  ;;  %194 = vmatpush.bf16.msra.mxu1 %v185_v4 }
  0x16   :  { %106 = vmatpush.bf16.msra.mxu0 %v184_v5  ;;  %195 = vmatpush.bf16.msra.mxu1 %v184_v5 }
  0x1a   :  { %107 = vmatpush.bf16.msra.mxu0 %v183_v6  ;;  %196 = vmatpush.bf16.msra.mxu1 %v183_v6 }
  0x1e   :  { %108 = vmatpush.bf16.msra.mxu0 %v182_v9  ;;  %197 = vmatpush.bf16.msra.mxu1 %v182_v9 }
  0x21   :  { %109 = vmatmul.bf16.vlgmr.msra.gmra.mxu0 %v181_v10  ;;  %114 = vmatmul.bf16.vlgmr.msra.gmra.mxu1 %v50_v11 }
  0x9e   :  { %v110_v13 = vpop.f32.mrf.mxu0  ;;  %v115_v14 = vpop.f32.mrf.mxu1 }
  0x9f   :  { %v135_v15 = vadd.f32 %v198_v12, %v110_v13  ;;  %v137_v16 = vadd.f32 %v198_v12, %v115_v14 }
  0xa1   :  { %138 = vst [vmem:[%s264_s3] sm:$0xff] %v135_v15 }
  0xa2   :  { %140 = vst [vmem:[%s264_s3 + $0x10] sm:$0xff] %v137_v16 }
  0xa6   :  { %v112_v17 = vpop.f32.mrf.mxu0  ;;  %v117_v18 = vpop.f32.mrf.mxu1 }
  0xa7   :  { %v136_v19 = vadd.f32 %v198_v12, %v112_v17 }
  0xa9   :  { %139 = vst [vmem:[%s264_s3 + $0x8] sm:$0xff] %v136_v19 }

// kernel: extras_forward_pallas.15
= control target key start
LH: loop header
LB: loop body
LE: loop exit
PB: predicated region body
PF: predicated region fallthrough
CT: control target
= control target key end

     0   :  { %s208_s1 = inlined_call_operand.vmem [shape: bf16[128,128], index: 1, kind: input, shape index: {}]   ;;  %s209_s2 = inlined_call_operand.vmem [shape: f32[1,128], index: 2, kind: input, shape index: {}]   ;;  %s210_s0 = inlined_call_operand.vmem [shape: bf16[8,128], index: 0, kind: input, shape index: {}]   ;;  %s211_s3 = inlined_call_operand.vmem [shape: f32[8,128], index: 3, kind: output, shape index: {}]  }
   0x1   :  { %v153_v0 = vld [vmem:[%s208_s1 + $0x38] sm:$0xff]  ;;  %v152_v1 = vld [vmem:[%s208_s1 + $0x30] sm:$0xff]  ;;  %v151_v2 = vld [vmem:[%s208_s1 + $0x28] sm:$0xff] }
   0x2   :  { %85 = vmatpush.bf16.msra.mxu0 %v153_v0  ;;  %v150_v3 = vld [vmem:[%s208_s1 + $0x20] sm:$0xff]  ;;  %v149_v4 = vld [vmem:[%s208_s1 + $0x18] sm:$0xff]  ;;  %v148_v5 = vld [vmem:[%s208_s1 + $0x10] sm:$0xff] }
   0x3   :  { %v147_v6 = vld [vmem:[%s208_s1 + $0x8] sm:$0xff]  ;;  %v146_v7 = vld [vmem:[%s208_s1] sm:$0xff] }
   0x4   :  { %v20_v8 = vld [vmem:[%s210_s0] sm:$0xf] }
   0x5   :  { %v154_v9 = vld [vmem:[%s209_s2] ss:$0 sm:$0xff] }
   0x6   :  { %86 = vmatpush.bf16.msra.mxu0 %v152_v1 }
   0xa   :  { %87 = vmatpush.bf16.msra.mxu0 %v151_v2 }
   0xe   :  { %88 = vmatpush.bf16.msra.mxu0 %v150_v3 }
  0x12   :  { %89 = vmatpush.bf16.msra.mxu0 %v149_v4 }
  0x16   :  { %90 = vmatpush.bf16.msra.mxu0 %v148_v5 }
  0x1a   :  { %91 = vmatpush.bf16.msra.mxu0 %v147_v6 }
  0x1e   :  { %92 = vmatpush.bf16.msra.mxu0 %v146_v7 }
  0x21   :  { %93 = vmatmul.bf16.vlgmr.msra.gmra.mxu0 %v20_v8 }
  0x9e   :  { %v94_v10 = vpop.f32.mrf.mxu0 }
  0x9f   :  { %v108_v11 = vadd.f32 %v154_v9, %v94_v10 }
  0xa1   :  { %109 = vst [vmem:[%s211_s3] sm:$0xff] %v108_v11 }
  0xa6   :  { %v96_v12 = vpop.f32.mrf.mxu0 }

</bundles_post_ra>
